<compile_context>
chip_gen: v6e
topology: v6e:2x2x1
jax: 0.10.0
libtpu: 0.0.40
codegen_flags: <defaults>
</compile_context>

<pallas_src>
import functools

import jax
import jax.numpy as jnp
from jax.experimental import pallas as pl
from jax.experimental.pallas import tpu as pltpu


# ---------------------------------------------------------------------------
# Pass 1: tiled spatial-sum accumulation + tiny FC head in the finalize step.
# ---------------------------------------------------------------------------
def _pool_fc_kernel(x_ref, w1t_ref, w2t_ref, y_ref, acc_ref, *, inv_hw):
    # x_ref:   (1, C, T)  input tile (dtype of x)
    # w1t_ref: (C, Cr)    fc1 weight, pre-transposed (VMEM-resident)
    # w2t_ref: (Cr, C)    fc2 weight, pre-transposed (VMEM-resident)
    # y_ref:   (1, C, 1)  f32 channel-attention scale (output, resident over s)
    # acc_ref: (1, C, 1)  f32 running spatial sum (scratch)
    s = pl.program_id(1)

    @pl.when(s == 0)
    def _init():
        acc_ref[...] = jnp.zeros_like(acc_ref)

    # Per-tile spatial sum in f32 (XLU cross-lane reduce on a lane-dense tile).
    acc_ref[...] += jnp.sum(
        x_ref[...].astype(jnp.float32), axis=-1, keepdims=True
    )

    @pl.when(s == pl.num_programs(1) - 1)
    def _finalize():
        pooled = acc_ref[...].reshape(1, -1) * inv_hw           # (1, C) mean
        h = jnp.dot(pooled, w1t_ref[...], preferred_element_type=jnp.float32)
        h = jnp.maximum(h, 0.0)                                  # ReLU
        y = jnp.dot(h, w2t_ref[...], preferred_element_type=jnp.float32)
        y = jax.nn.sigmoid(y)                                    # (1, C)
        y_ref[...] = y[:, :, None]                               # (1, C, 1)


# ---------------------------------------------------------------------------
# Pass 2: streaming channel rescale, out = x * y (lane-broadcast of y).
# ---------------------------------------------------------------------------
def _rescale_kernel(x_ref, y_ref, o_ref):
    o_ref[...] = (x_ref[...].astype(jnp.float32) * y_ref[...]).astype(o_ref.dtype)


def _pick_tile(hw, c, itemsize, max_tile_lanes=4096, max_tile_bytes=1 << 20):
    """Largest multiple-of-128 divisor of hw under the lane/byte caps."""
    if hw % 128 != 0:
        return hw  # full-extent block is always a legal BlockSpec
    bytes_cap = max(128, (max_tile_bytes // max(1, c * itemsize)) // 128 * 128)
    t = max(128, min(hw, max_tile_lanes, bytes_cap))
    while hw % t != 0:
        t -= 128
    return t


def ca_layer(x_nchw, w1, w2, *, max_tile_lanes=4096):
    """Channel-attention forward.

    x_nchw: (B, C, H, W)
    w1:     (C//r, C)   -- nn.Linear(channel, channel//reduction, bias=False).weight
    w2:     (C, C//r)   -- nn.Linear(channel//reduction, channel, bias=False).weight
    Returns (B, C, H, W) in x's dtype.
    """
    B, C, H, W = x_nchw.shape
    HW = H * W
    Cr = w1.shape[0]

    x_flat = x_nchw.reshape(B, C, HW)

    # Pre-transpose weights in the wrapper (no in-kernel .T / transpose).
    w1t = jnp.asarray(w1, jnp.float32).T   # (C, Cr)
    w2t = jnp.asarray(w2, jnp.float32).T   # (Cr, C)

    T = _pick_tile(HW, C, x_flat.dtype.itemsize, max_tile_lanes=max_tile_lanes)
    S = HW // T

    # ---- pass 1: pooled mean over spatial tiles -> y = sigmoid(fc2(relu(fc1(.)))) ----
    pool_kernel = functools.partial(_pool_fc_kernel, inv_hw=1.0 / float(HW))
    y = pl.pallas_call(
        pool_kernel,
        out_shape=jax.ShapeDtypeStruct((B, C, 1), jnp.float32),
        grid=(B, S),
        in_specs=[
            pl.BlockSpec((1, C, T), lambda b, s: (b, 0, s)),
            pl.BlockSpec((C, Cr), lambda b, s: (0, 0)),   # weights stay resident
            pl.BlockSpec((Cr, C), lambda b, s: (0, 0)),
        ],
        out_specs=pl.BlockSpec((1, C, 1), lambda b, s: (b, 0, 0)),
        scratch_shapes=[pltpu.VMEM((1, C, 1), jnp.float32)],
        compiler_params=pltpu.CompilerParams(
            dimension_semantics=("parallel", "arbitrary")),
    )(x_flat, w1t, w2t)

    # ---- pass 2: streaming rescale out = x * y ----
    out_flat = pl.pallas_call(
        _rescale_kernel,
        out_shape=jax.ShapeDtypeStruct((B, C, HW), x_nchw.dtype),
        grid=(B, S),
        in_specs=[
            pl.BlockSpec((1, C, T), lambda b, s: (b, 0, s)),
            pl.BlockSpec((1, C, 1), lambda b, s: (b, 0, 0)),  # tiny y, resident per-b
        ],
        out_specs=pl.BlockSpec((1, C, T), lambda b, s: (b, 0, s)),
        compiler_params=pltpu.CompilerParams(
            dimension_semantics=("parallel", "parallel")),
    )(x_flat, y)

    return out_flat.reshape(B, C, H, W)


def _reference(x, w1, w2):
    # pure-JAX reference of the PyTorch forward
    pooled = x.mean(axis=(2, 3))                    # (B, C)
    h = jnp.maximum(pooled @ w1.T, 0.0)             # (B, C//r)
    y = jax.nn.sigmoid(h @ w2.T)                    # (B, C)
    return x * y[:, :, None, None]


if __name__ == "__main__":
    B, C, H, W = 2, 4, 16, 16
    reduction = 2

    key = jax.random.PRNGKey(0)
    kx, k1, k2 = jax.random.split(key, 3)

    x = jax.random.normal(kx, (B, C, H, W), dtype=jnp.float32)
    # nn.Linear(channel, channel//reduction, bias=False) and
    # nn.Linear(channel//reduction, channel, bias=False) weights.
    w1 = jax.random.normal(k1, (C // reduction, C), dtype=jnp.float32) * 0.5
    w2 = jax.random.normal(k2, (C, C // reduction), dtype=jnp.float32) * 0.5

    # Force a small spatial tile (128 lanes -> 2 spatial grid steps) so the
    # tiled accumulation path is actually exercised at this test size.
    out = ca_layer(x, w1, w2, max_tile_lanes=128)
    jax.block_until_ready(out)

    ref = _reference(x, w1, w2)
    assert out.shape == ref.shape
    assert jnp.allclose(out, ref, atol=1e-5, rtol=1e-5), "mismatch vs reference"

    print("KERNEL_OK")
</pallas_src>

<mosaic_0001>
module attributes {stable_mosaic.version = 11 : i64} {
  func.func @_pool_fc_kernel(%arg0: i32, %arg1: i32, %arg2: memref<1x4x128xf32, #tpu.memory_space<vmem>>, %arg3: memref<4x2xf32, #tpu.memory_space<vmem>>, %arg4: memref<2x4xf32, #tpu.memory_space<vmem>>, %arg5: memref<1x4x1xf32, #tpu.memory_space<vmem>>, %arg6: memref<1x4x1xf32, #tpu.memory_space<vmem>>) attributes {dimension_semantics = [#tpu.dimension_semantics<parallel>, #tpu.dimension_semantics<arbitrary>], iteration_bounds = array<i64: 2, 2>, scalar_prefetch = 0 : i64, scratch_operands = 1 : i64, tpu.core_type = #tpu.core_type<tc>, window_params = [{transform_indices = @transform_0, window_bounds = array<i64: 1, 4, 128>}, {pipeline_mode = #tpu.pipeline_mode<synchronous>, transform_indices = @transform_1, window_bounds = array<i64: 4, 2>}, {pipeline_mode = #tpu.pipeline_mode<synchronous>, transform_indices = @transform_2, window_bounds = array<i64: 2, 4>}, {transform_indices = @transform_3, window_bounds = array<i64: 1, 4, 1>}]} {
    %c0_i32 = arith.constant 0 : i32
    %0 = arith.cmpi eq, %arg1, %c0_i32 : i32
    %1 = arith.extui %0 : i1 to i32
    %c0_i32_0 = arith.constant 0 : i32
    %2 = arith.cmpi ne, %1, %c0_i32_0 : i32
    scf.if %2 {
      %cst_10 = arith.constant 0.000000e+00 : f32
      %12 = vector.broadcast %cst_10 : f32 to vector<1x4x1xf32>
      %c0_11 = arith.constant 0 : index
      %c0_12 = arith.constant 0 : index
      %c0_13 = arith.constant 0 : index
      %13 = vector.load %arg6[%c0_11, %c0_12, %c0_13] : memref<1x4x1xf32, #tpu.memory_space<vmem>>, vector<1x4x1xf32>
      tpu.vector_store %arg6[%c0_11, %c0_12, %c0_13], %12 {strides = array<i32>} : memref<1x4x1xf32, #tpu.memory_space<vmem>>, vector<1x4x1xf32>,
    } else {
    }
    %c0 = arith.constant 0 : index
    %c0_1 = arith.constant 0 : index
    %c0_2 = arith.constant 0 : index
    %3 = vector.load %arg6[%c0, %c0_1, %c0_2] : memref<1x4x1xf32, #tpu.memory_space<vmem>>, vector<1x4x1xf32>
    %c0_3 = arith.constant 0 : index
    %c0_4 = arith.constant 0 : index
    %c0_5 = arith.constant 0 : index
    %4 = vector.load %arg2[%c0_3, %c0_4, %c0_5] : memref<1x4x128xf32, #tpu.memory_space<vmem>>, vector<1x4x128xf32>
    %cst = arith.constant dense<0.000000e+00> : vector<1x4xf32>
    %5 = vector.multi_reduction <add>, %4, %cst [2] : vector<1x4x128xf32> to vector<1x4xf32>
    %6 = vector.shape_cast %5 : vector<1x4xf32> to vector<1x4x1xf32>
    %7 = arith.addf %3, %6 : vector<1x4x1xf32>
    %c0_6 = arith.constant 0 : index
    %c0_7 = arith.constant 0 : index
    %c0_8 = arith.constant 0 : index
    %8 = vector.load %arg6[%c0_6, %c0_7, %c0_8] : memref<1x4x1xf32, #tpu.memory_space<vmem>>, vector<1x4x1xf32>
    tpu.vector_store %arg6[%c0_6, %c0_7, %c0_8], %7 {strides = array<i32>} : memref<1x4x1xf32, #tpu.memory_space<vmem>>, vector<1x4x1xf32>,
    %c1_i32 = arith.constant 1 : i32
    %9 = arith.cmpi eq, %arg1, %c1_i32 : i32
    %10 = arith.extui %9 : i1 to i32
    %c0_i32_9 = arith.constant 0 : i32
    %11 = arith.cmpi ne, %10, %c0_i32_9 : i32
    scf.if %11 {
      %c0_10 = arith.constant 0 : index
      %c0_11 = arith.constant 0 : index
      %c0_12 = arith.constant 0 : index
      %12 = vector.load %arg6[%c0_10, %c0_11, %c0_12] : memref<1x4x1xf32, #tpu.memory_space<vmem>>, vector<1x4x1xf32>
      %13 = vector.shape_cast %12 : vector<1x4x1xf32> to vector<1x4xf32>
      %cst_13 = arith.constant 3.906250e-03 : f32
      %14 = vector.broadcast %cst_13 : f32 to vector<1x4xf32>
      %15 = arith.mulf %13, %14 : vector<1x4xf32>
      %c0_14 = arith.constant 0 : index
      %c0_15 = arith.constant 0 : index
      %16 = vector.load %arg3[%c0_14, %c0_15] : memref<4x2xf32, #tpu.memory_space<vmem>>, vector<4x2xf32>
      %cst_16 = arith.constant dense<0.000000e+00> : vector<1x2xf32>
      %17 = tpu.matmul %15, %16, %cst_16 {dimension_numbers = #tpu.dot_dimension_numbers<[1], [0], [0], [1], [0, 0, 1, 1], [], []>} : vector<1x4xf32>, vector<4x2xf32>, vector<1x2xf32> -> vector<1x2xf32>
      %cst_17 = arith.constant 0.000000e+00 : f32
      %18 = vector.broadcast %cst_17 : f32 to vector<1x2xf32>
      %19 = arith.maximumf %17, %18 : vector<1x2xf32>
      %c0_18 = arith.constant 0 : index
      %c0_19 = arith.constant 0 : index
      %20 = vector.load %arg4[%c0_18, %c0_19] : memref<2x4xf32, #tpu.memory_space<vmem>>, vector<2x4xf32>
      %cst_20 = arith.constant dense<0.000000e+00> : vector<1x4xf32>
      %21 = tpu.matmul %19, %20, %cst_20 {dimension_numbers = #tpu.dot_dimension_numbers<[1], [0], [0], [1], [0, 0, 1, 1], [], []>} : vector<1x2xf32>, vector<2x4xf32>, vector<1x4xf32> -> vector<1x4xf32>
      %22 = arith.negf %21 : vector<1x4xf32>
      %23 = math.exp %22 : vector<1x4xf32>
      %cst_21 = arith.constant 1.000000e+00 : f32
      %24 = vector.broadcast %cst_21 : f32 to vector<1x4xf32>
      %25 = arith.addf %24, %23 : vector<1x4xf32>
      %26 = arith.divf %24, %25 : vector<1x4xf32>
      %27 = vector.shape_cast %26 : vector<1x4xf32> to vector<1x4x1xf32>
      %c0_22 = arith.constant 0 : index
      %c0_23 = arith.constant 0 : index
      %c0_24 = arith.constant 0 : index
      %28 = vector.load %arg5[%c0_22, %c0_23, %c0_24] : memref<1x4x1xf32, #tpu.memory_space<vmem>>, vector<1x4x1xf32>
      tpu.vector_store %arg5[%c0_22, %c0_23, %c0_24], %27 {strides = array<i32>} : memref<1x4x1xf32, #tpu.memory_space<vmem>>, vector<1x4x1xf32>,
    } else {
    }
    return
  }
  func.func @transform_0(%arg0: i32, %arg1: i32) -> (i32, i32, i32) {
    %c0_i32 = arith.constant 0 : i32
    %c0_i32_0 = arith.constant 0 : i32
    return %arg0, %c0_i32, %arg1 : i32, i32, i32
  }
  func.func @transform_1(%arg0: i32, %arg1: i32) -> (i32, i32) {
    %c0_i32 = arith.constant 0 : i32
    %c0_i32_0 = arith.constant 0 : i32
    %c0_i32_1 = arith.constant 0 : i32
    return %c0_i32, %c0_i32_0 : i32, i32
  }
  func.func @transform_2(%arg0: i32, %arg1: i32) -> (i32, i32) {
    %c0_i32 = arith.constant 0 : i32
    %c0_i32_0 = arith.constant 0 : i32
    %c0_i32_1 = arith.constant 0 : i32
    return %c0_i32, %c0_i32_0 : i32, i32
  }
  func.func @transform_3(%arg0: i32, %arg1: i32) -> (i32, i32, i32) {
    %c0_i32 = arith.constant 0 : i32
    %c0_i32_0 = arith.constant 0 : i32
    %c0_i32_1 = arith.constant 0 : i32
    return %arg0, %c0_i32, %c0_i32_0 : i32, i32, i32
  }
}

</mosaic_0001>

<bundles_post_ra>
// kernel: tpu_custom_call.1
= control target key start
LH: loop header
LB: loop body
LE: loop exit
PB: predicated region body
PF: predicated region fallthrough
CT: control target
= control target key end

     0   :  { %8 = vsyncpa [#allocation4], 0  ;;  %s856_s0 = inlined_call_operand.hbm [shape: f32[2,4,256], index: 0, kind: input, shape index: {}]   ;;  %s857_s1 = inlined_call_operand.vmem [shape: f32[4,2], index: 1, kind: input, shape index: {}]   ;;  %s858_s2 = inlined_call_operand.vmem [shape: f32[2,4], index: 2, kind: input, shape index: {}]   ;;  %s859_s3 = inlined_call_operand.vmem [shape: f32[2,4,1], index: 3, kind: output, shape index: {}]  }
   0x1   :  { %10 = vsyncpa [#allocation4 + $0x1], 0  ;;  %s716_s12 = smov 0   ;;  %s718_s13 = smov 0  }
   0x2   :  { %s720_s14 = smov 0   ;;  %s722_s15 = smov 0  }
   0x3   :  { %s724_s16 = smov 0   ;;  %s726_s17 = smov 0  }
   0x4   :  { %s728_s18 = smov 0   ;;  %s730_s19 = smov 0  }
   0x5 LB: > { %s482_s20 = sadd.s32 4294967295, %s689_s19   ;;  %s25_s21 = sadd.s32 1, %s681_s17  ;;  %s689_s19 = sphi %s730_s19, %s16_s19   ;;  %s685_s18 = sphi %s728_s18, %s869_s18   ;;  %s681_s17 = sphi %s726_s17, %s868_s17   ;;  %s677_s16 = sphi %s724_s16, %s867_s16   ;;  %s673_s15 = sphi %s722_s15, %s866_s15   ;;  %s669_s14 = sphi %s720_s14, %s865_s14   ;;  %s665_s13 = sphi %s718_s13, %s864_s13   ;;  %s661_s12 = sphi %s716_s12, %s863_s12  }
   0x6   : > { %p26_p0 = scmp.ge.s32.totalorder %s25_s21, 2  ;;  %s28_s22 = sadd.s32 1, %s685_s18 }
   0x7   : > { %s37_s23 = sadd.s32 1, %s669_s14  ;;  %p44_p1 = scmp.ne.s32.totalorder %s669_s14, %s665_s13 }
   0x8   : > { %s871_s21 = smov (%p26_p0, %s25_s21), 0  ;;  %s873_s22 = smov (!%p26_p0, %s28_s22), %s685_s18 }
   0x9   : > { %s33_s24 = ssub.s32 %s681_s17, %s871_s21  ;;  %p45_p2 = scmp.eq.s32.totalorder %s689_s19, 0 }
   0xa   : > { %p30_p3 = scmp.ge.s32.totalorder %s873_s22, 2  ;;  %p50_p4 = scmp.ne.s32.totalorder %s665_s13, %s661_s12 }
   0xb   : > { %p767_p5 = por %p45_p2, %p44_p1  ;;  %p51_p6 = scmp.eq.s32.totalorder %s482_s20, 0 }
   0xc   : > { %s875_s22 = smov (%p30_p3, %s873_s22), 0  ;;  %p521_p8 = scmp.lt.s32.totalorder %s689_s19, 4 }
   0xd   : > { %p773_p7 = por %p51_p6, %p50_p4  ;;  %s32_s27 = ssub.s32 %s685_s18, %s875_s22 }
   0xe   : > { %s34_s28 = sor.u32 %s33_s24, %s32_s27  ;;  %s148_s29 = sand.u32 1, %s669_s14  }
   0xf   : > { %p35_p9 = scmp.eq.s32.totalorder %s34_s28, 0  ;;  %s486_s30 = sshll.u32 %s148_s29, 2 }
  0x10   : > { %s487_s4 = sshll.u32 %s685_s18, 1  ;;  %s152_s8 = scalar_lea.vmem [#allocation3], %s486_s30 }
  0x11   : > { %s783_s5 = scalar_select %p35_p9, %s669_s14, %s37_s23  }
  0x12   : > { %s157_s6 = sadd.s32 %s681_s17, %s487_s4  ;;  %s161_s9 = sshll.u32 %s152_s8, 4  ;;  %s162_s9 = int_to_ptr.vmem [resolvable:$true] %s161_s9 }
  0x13   : > { %s488_s7 = sshll.u32 %s157_s6, 6  ;;  %p793_p10 = pnand %p521_p8, %p767_p5 }
  0x14   : > { %s159_s12 = scalar_lea.hbm %s856_s0, %s488_s7  ;;  %p489_p11 = scmp.ge.s32.totalorder %s689_s19, 1 }
  0x15   : > { %p166_p12 = scmp.lt.s32.totalorder %s689_s19, 5  ;;  %s149_s23 = scalar_lea.sflag [#allocation4], %s148_s29 }
  0x16   : > { %p597_p13 = pneg %p793_p10  ;;  %s608_s24 = scalar_lea.vmem %s162_s9, 64 }
  0x17   : > { %p609_p0 = scmp.ne.s32.totalorder %s162_s9, %s608_s24  ;;  %s691_s27 = smov [#allocation3]  }
  0x18   : > { %s613_s28 = sshll.u32 %s691_s27, 4  ;;  %s614_s28 = int_to_ptr.vmem [resolvable:$false] %s613_s28 }
  0x19   : > { %p611_p1 = pnand %p609_p0, %p597_p13  ;;  %s615_s30 = scalar_lea.vmem %s614_s28, 128 }
  0x1a   : > { %p616_p3 = scmp.lt.s32.totalorder %s162_s9, %s614_s28  ;;  %p617_p4 = scmp.lt.s32.totalorder %s615_s30, %s608_s24 }
  0x1b   : > { %p612_p2 = pneg %p611_p1 }
  0x1c   : > { %p618_p5 = por %p617_p4, %p616_p3 }
  0x1e   : > { %p619_p6 = pnand %p618_p5, %p612_p2 }
  0x20   : > { %622 = shalt.err (!%p619_p6)
}
  0x21   : > { %520 = dma.hbm_to_vmem [thread:$0]  (!%p793_p10), %s159_s12, 64, %s162_s9, %s149_s23  }
  0x22   : > { %p167_p8 = pnand %p489_p11, %p166_p12 }
  0x23   : > { %s172_s25 = sand.u32 (!%p167_p8), 1, %s665_s13  }
  0x24   : > { %170 = sbr.rel (%p167_p8) target bundleno = 867 (0x363), region = 32  ;;  %s490_s29 = sshll.u32 (!%p167_p8), %s172_s25, 2 }
  0x25   : > { %s173_s4 = scalar_lea.sflag (!%p167_p8), [#allocation4], %s172_s25  ;;  %s176_s6 = scalar_lea.vmem (!%p167_p8), [#allocation3], %s490_s29 }
  0x29   : > { %656 = dma.done.wait (%p773_p7), %s173_s4, 64  }
  0x2a   : > { %658 = vsyncadd (%p773_p7), %s173_s4, 4294967232  ;;  %p198_p9 = scmp.lt.s32.totalorder %s677_s16, 1  ;;  %p492_p10 = scmp.ne.s32.totalorder %s673_s15, 0 }
  0x2c   : > { %s877_s16 = smov (!%p198_p9, %s677_s16), 1  ;;  %205 = sbr.rel (%p492_p10) target bundleno = 51 (0x33), region = 40 }
  0x2d   : > { %s491_s7 = sshll.u32 %s877_s16, 2 }
  0x2e   : > { %s817_s10 = scalar_lea.vmem %s859_s3, %s491_s7 }
  0x31   : > { %vm206_vm0 = vcmask 3072   ;;  %v692_v0 = vmov 0.0  }
  0x32   : > { %207 = vst.msk [vmem:[#allocation2] sm:$0xf] %vm206_vm0, %v692_v0 }
  0x33 PF: > { %v209_v1 = vld [vmem:[%s176_s6] sm:$0xf]  ;;  %vm210_vm1 = vcmask 1043456   ;;  %vm215_vm2 = vcmask 3072   ;;  %p493_p7 = scmp.ne.s32.totalorder %s673_s15, 1 }
  0x34   : > { %v211_v2 = vsel %vm210_vm1, %v209_v1, 0.0 }
  0x35   : > { %212 = vadd.xlane.f32.xlu0 %v211_v2 }
  0x39   : > { %v208_v3 = vld [vmem:[#allocation2] sm:$0xf] }
  0xbd   : > { %220 = sbr.rel (%p493_p7) target bundleno = 867 (0x363), region = 44 }
  0xbe   : > { %v213_v4 = vpop.xlane.xlu0 %212 }
  0xbf   : > { %v214_v5 = vadd.f32 %v213_v4, %v208_v3 }
  0xc1   : > { %216 = vst.msk [vmem:[#allocation2] sm:$0xf] %vm215_vm2, %v214_v5 }
  0xc2   : > { %v223_v7 = vld [vmem:[%s857_s1] sm:$0xf]  ;;  %v693_v8 = vmov 0   ;;  %v694_v10 = vmov 0.0   ;;  %vm695_vm3 = vmmov 0   ;;  %v228_v11 = vlaneseq }
  0xc3   : > { %590 = vset.pattern.permute.xlu0 %v693_v8  ;;  %505 = vmatprep.subr.mxu0 %v694_v10  ;;  %vm234_vm4 = vcmask 31744   ;;  %v311_v17 = vld [vmem:[%s858_s2] sm:$0x3]  ;;  %vm316_vm5 = vcmask 1041408   ;;  %vm312_vm6 = vcmask 15360  }
  0xc4   : > { %506 = vmatpush3.msk.msra.mxu0 %vm210_vm1, %v223_v7  ;;  %507 = vmatprep.mubr.msk.f32.mxu0 %vm695_vm3, %v694_v10  ;;  %v229_v12 = vand.u32 127, %v228_v11  ;;  %v231_v13 = vshrl.u32 %v228_v11, 7 }
  0xc5   : > { %510 = vmatprep.subr.mxu1 %v694_v10  ;;  %512 = vmatprep.mubr.msk.f32.mxu1 %vm695_vm3, %v694_v10 }
  0xc6   : > { %v232_v14 = vsub.s32 %v229_v12, %v231_v13  ;;  %511 = vmatpush3.msk.msra.mxu1 %vm316_vm5, %v311_v17  ;;  %v398_v26 = vsub.s32 0, %v231_v13 }
  0xc8   : > { %v221_v6 = vld [vmem:[#allocation2] sm:$0xf] }
  0xc9   : > { %v222_v9 = vmul.f32 0.00390625, %v221_v6 }
  0xcb   : > { %226 = vperm.xlu0 %590, %v222_v9  }
 0x146   : > { %v227_v15 = vpop.permute.xlu0 %226 }
 0x147   : > { %v233_v16 = vrot.slane %v227_v15, %v232_v14 }
 0x149   : > { %508 = vmatmul.mubr.msk.f32.vlgmr.msra.gmra.mxu0 %vm234_vm4, %v233_v16 }
 0x209   : > { %v306_v18 = vpop.f32.mrf.mxu0 }
 0x20a   : > { %v310_v19 = vmax.f32 %v306_v18, 0.0 }
 0x20b   : > { %v509_v20 = vpop.f32.mrf.mxu0 }
 0x20c   : > { %513 = vmatmul.mubr.msk.f32.vlgmr.msra.gmra.mxu1 %vm312_vm6, %v310_v19 }
 0x2cc   : > { %v386_v21 = vpop.f32.mrf.mxu1 }
 0x2cd   : > { %v498_v22 = vmul.f32 -1.442695, %v386_v21 }
 0x2ce   : > { %v514_v23 = vpop.f32.mrf.mxu1 }
 0x2cf   : > { %591 = vpow2.f32 %v498_v22 }
 0x2dc   : > { %v592_v24 = vpop.eup %591 }
 0x2dd   : > { %v393_v25 = vadd.f32 1.0, %v592_v24 }
 0x2df   : > { %593 = vrcp.f32 %v393_v25 }
 0x2ec   : > { %v594_v27 = vpop.eup %593 }
 0x2ed   : > { %v399_v28 = vrot.slane %v594_v27, %v398_v26 }
 0x2ef   : > { %401 = vbcast.lane.b32.xlu0 %v399_v28, 256 }
 0x361   : > { %v402_v29 = vpop.permute.xlu0 %401 }
 0x362   : > { %403 = vst.msk [vmem:[%s817_s10] sm:$0xf] %vm215_vm2, %v402_v29 }
 0x363 PF: > { %s16_s19 = sadd.s32 1, %s689_s19   ;;  %s863_s12 = smov %s665_s13 }
 0x364   : > { %p13_p11 = scmp.ge.s32.totalorder %s16_s19, 6   ;;  %s864_s13 = smov %s669_s14 }
 0x365   : > { %s865_s14 = smov %s783_s5  ;;  %s866_s15 = smov %s681_s17 }
 0x366   : > { %s867_s16 = smov %s685_s18  ;;  %s868_s17 = smov %s871_s21 }
 0x367   : > { %s869_s18 = smov %s875_s22  ;;  %15 = sbr.rel (!%p13_p11) target bundleno = 5 (0x5), region = 80 }
 0x36c   :  { %423 = vsyncpa [#allocation4], 1 }
 0x36d   :  { %425 = vsyncpa [#allocation4 + $0x1], 1 }

</bundles_post_ra>
